<compile_context>
chip_gen: v7x
topology: tpu7x:2x2x1
jax: 0.10.0
libtpu: 0.0.40
codegen_flags: <defaults>
</compile_context>

<pallas_src>
import functools

import jax
import jax.numpy as jnp
from jax.experimental import pallas as pl
from jax.experimental.pallas import tpu as pltpu


def _round_up(x, m):
    return (x + m - 1) // m * m


def dense_block_kernel(x_ref, w_ref, b_ref, o_ref, acc_ref, *,
                       layer_norm, act, eps, n_valid):
    """acc = bias + sum_k x_tile @ w_tile; LN/act epilogue on the last k step.

    x_ref: (tm, tk) bf16   w_ref: (tk, tn) bf16   b_ref: (1, tn) f32
    o_ref: (tm, tn)        acc_ref: (tm, tn) f32 scratch (lives across k)
    """
    k = pl.program_id(2)

    @pl.when(k == 0)
    def _init():
        # Fold the bias into the accumulator init (no separate epilogue add).
        acc_ref[...] = jnp.broadcast_to(b_ref[...], acc_ref.shape)

    acc_ref[...] += jnp.dot(x_ref[...], w_ref[...],
                            preferred_element_type=jnp.float32)

    @pl.when(k == pl.num_programs(2) - 1)
    def _epilogue():
        y = acc_ref[...]
        if layer_norm:
            # One-pass LayerNorm: var = E[y^2] - E[y]^2. Padded columns of y
            # are exactly zero (zero weight cols / zero bias), so sums over the
            # padded tile equal sums over the n_valid real columns.
            inv_n = 1.0 / float(n_valid)
            mean = jnp.sum(y, axis=-1, keepdims=True) * inv_n
            ex2 = jnp.sum(y * y, axis=-1, keepdims=True) * inv_n
            var = ex2 - mean * mean
            y = (y - mean) * jax.lax.rsqrt(var + eps)
        if act == "relu":
            y = jnp.maximum(y, 0.0)
        elif act == "lrelu":
            y = jnp.where(y >= 0.0, y, 0.2 * y)
        # act is None -> identity.
        o_ref[...] = y.astype(o_ref.dtype)


def prepare_dense_block_params(weight, bias, *, compute_dtype=jnp.bfloat16):
    """One-time parameter prep (hoisted out of the per-call forward path).

    weight: (out_features, in_features) as in torch.nn.Linear; bias: (out,).
    Returns (w_pad, b_pad): weight transposed to (K, N), zero-padded so K and N
    are multiples of 128, cast to compute_dtype; bias zero-padded to the same
    N, kept in f32, shaped (1, Np).
    """
    n_out, k_in = weight.shape
    kp = _round_up(k_in, 128)
    np_ = _round_up(n_out, 128)
    w_t = jnp.asarray(weight).T.astype(compute_dtype)            # (K, N)
    w_pad = jnp.pad(w_t, ((0, kp - k_in), (0, np_ - n_out)))
    b_pad = jnp.pad(jnp.asarray(bias).astype(jnp.float32),
                    (0, np_ - n_out)).reshape(1, np_)
    return w_pad, b_pad


def dense_block(x, w_pad, b_pad, *, out_features, layer_norm=False,
                act="relu", eps=1e-5):
    """DenseBlock forward. x: (B, K) — w_pad/b_pad from prepare_dense_block_params."""
    B, K = x.shape
    Kp, Np = w_pad.shape
    compute_dtype = w_pad.dtype

    # ---- tile sizes ----------------------------------------------------------
    # Row tile: full (8-aligned) batch if small, else 256-row tiles.
    tm = _round_up(max(B, 1), 8) if B <= 256 else 256
    Bp = _round_up(B, tm)
    # Reduction tile: largest of {512, 256, 128} that divides the padded K.
    tk = next(t for t in (512, 256, 128) if Kp % t == 0)
    # Output tile: LayerNorm reduces over the whole feature dim -> keep the
    # full padded N in one tile; otherwise lane-dense 256/128 tiles.
    tn = Np if layer_norm else next(t for t in (256, 128) if Np % t == 0)

    # ---- pad + cast the activation (weights were prepped once at init) ------
    x_p = x
    if (Bp, Kp) != (B, K):
        x_p = jnp.pad(x, ((0, Bp - B), (0, Kp - K)))
    x_p = x_p.astype(compute_dtype)

    # ---- VMEM budget (double-buffered inputs/outputs + accumulator) ---------
    in_b = jnp.dtype(compute_dtype).itemsize
    out_b = jnp.dtype(x.dtype).itemsize
    est = (2 * (tm * tk + tk * tn) * in_b   # double-buffered x / w tiles
           + 2 * tn * 4                     # bias tile
           + 2 * tm * tn * out_b            # double-buffered output tile
           + tm * tn * 4)                   # f32 accumulator
    vmem_limit = int(min(64 * 2**20, max(32 * 2**20, 2 * est)))

    kernel = functools.partial(dense_block_kernel, layer_norm=layer_norm,
                               act=act, eps=eps, n_valid=out_features)

    grid = (Bp // tm, Np // tn, Kp // tk)
    out = pl.pallas_call(
        kernel,
        out_shape=jax.ShapeDtypeStruct((Bp, Np), x.dtype),
        grid_spec=pltpu.PrefetchScalarGridSpec(
            num_scalar_prefetch=0,
            grid=grid,
            in_specs=[
                pl.BlockSpec((tm, tk), lambda i, j, k: (i, k)),
                pl.BlockSpec((tk, tn), lambda i, j, k: (k, j)),
                pl.BlockSpec((1, tn), lambda i, j, k: (0, j)),
            ],
            out_specs=pl.BlockSpec((tm, tn), lambda i, j, k: (i, j)),
            scratch_shapes=[pltpu.VMEM((tm, tn), jnp.float32)],
        ),
        compiler_params=pltpu.CompilerParams(
            dimension_semantics=("parallel", "parallel", "arbitrary"),
            vmem_limit_bytes=vmem_limit,
        ),
    )(x_p, w_pad, b_pad)

    return out[:B, :out_features]


if __name__ == "__main__":
    # Small shapes consistent with the module's forward (Linear on 2-D input).
    batch, in_features, out_features = 8, 32, 64

    key = jax.random.PRNGKey(0)
    kx, kw, kb = jax.random.split(key, 3)

    # Deterministic, PyTorch-like init: U(-1/sqrt(in), 1/sqrt(in)).
    bound = 1.0 / (in_features ** 0.5)
    x = jax.random.normal(kx, (batch, in_features), dtype=jnp.float32)
    weight = jax.random.uniform(kw, (out_features, in_features),
                                minval=-bound, maxval=bound, dtype=jnp.float32)
    bias = jax.random.uniform(kb, (out_features,),
                              minval=-bound, maxval=bound, dtype=jnp.float32)

    # One-time weight prep (transpose + pad + bf16 cast), hoisted out of forward.
    w_pad, b_pad = prepare_dense_block_params(weight, bias)

    # Pure-JAX reference with the same bf16 input rounding / f32 accumulation.
    xb = x.astype(jnp.bfloat16).astype(jnp.float32)
    wb = weight.astype(jnp.bfloat16).astype(jnp.float32)
    y_lin = xb @ wb.T + bias

    # Case 1: default DenseBlock config (no norms, ReLU).
    out1 = jax.block_until_ready(
        dense_block(x, w_pad, b_pad, out_features=out_features,
                    layer_norm=False, act="relu"))
    ref1 = jnp.maximum(y_lin, 0.0)
    assert out1.shape == (batch, out_features)
    assert jnp.allclose(out1, ref1, atol=1e-3, rtol=1e-3), "relu path mismatch"

    # Case 2: layer_norm=True, LeakyReLU(0.2).
    out2 = jax.block_until_ready(
        dense_block(x, w_pad, b_pad, out_features=out_features,
                    layer_norm=True, act="lrelu"))
    mean = y_lin.mean(-1, keepdims=True)
    var = ((y_lin - mean) ** 2).mean(-1, keepdims=True)
    yn = (y_lin - mean) / jnp.sqrt(var + 1e-5)
    ref2 = jnp.where(yn >= 0.0, yn, 0.2 * yn)
    assert out2.shape == (batch, out_features)
    assert jnp.allclose(out2, ref2, atol=2e-3, rtol=2e-3), "layernorm path mismatch"

    print("KERNEL_OK")
</pallas_src>

<mosaic_0001>
module attributes {stable_mosaic.version = 11 : i64} {
  func.func @dense_block_kernel(%arg0: i32, %arg1: i32, %arg2: i32, %arg3: memref<8x128xbf16, #tpu.memory_space<vmem>>, %arg4: memref<128x128xbf16, #tpu.memory_space<vmem>>, %arg5: memref<1x128xf32, #tpu.memory_space<vmem>>, %arg6: memref<8x128xf32, #tpu.memory_space<vmem>>, %arg7: memref<8x128xf32, #tpu.memory_space<vmem>>) attributes {dimension_semantics = [#tpu.dimension_semantics<parallel>, #tpu.dimension_semantics<parallel>, #tpu.dimension_semantics<arbitrary>], iteration_bounds = array<i64: 1, 1, 1>, scalar_prefetch = 0 : i64, scratch_operands = 1 : i64, tpu.core_type = #tpu.core_type<tc>, window_params = [{transform_indices = @transform_0, window_bounds = array<i64: 8, 128>}, {transform_indices = @transform_1, window_bounds = array<i64: 128, 128>}, {transform_indices = @transform_2, window_bounds = array<i64: 1, 128>}, {transform_indices = @transform_3, window_bounds = array<i64: 8, 128>}]} {
    %c0_i32 = arith.constant 0 : i32
    %0 = arith.cmpi eq, %arg2, %c0_i32 : i32
    %1 = arith.extui %0 : i1 to i32
    %c0_i32_0 = arith.constant 0 : i32
    %2 = arith.cmpi ne, %1, %c0_i32_0 : i32
    scf.if %2 {
      %c0_10 = arith.constant 0 : index
      %c0_11 = arith.constant 0 : index
      %12 = vector.load %arg5[%c0_10, %c0_11] : memref<1x128xf32, #tpu.memory_space<vmem>>, vector<1x128xf32>
      %13 = vector.shape_cast %12 : vector<1x128xf32> to vector<1x128xf32>
      %14 = vector.broadcast %13 : vector<1x128xf32> to vector<8x128xf32>
      %c0_12 = arith.constant 0 : index
      %c0_13 = arith.constant 0 : index
      %15 = vector.load %arg7[%c0_12, %c0_13] : memref<8x128xf32, #tpu.memory_space<vmem>>, vector<8x128xf32>
      tpu.vector_store %arg7[%c0_12, %c0_13], %14 {strides = array<i32>} : memref<8x128xf32, #tpu.memory_space<vmem>>, vector<8x128xf32>,
    } else {
    }
    %c0 = arith.constant 0 : index
    %c0_1 = arith.constant 0 : index
    %3 = vector.load %arg7[%c0, %c0_1] : memref<8x128xf32, #tpu.memory_space<vmem>>, vector<8x128xf32>
    %c0_2 = arith.constant 0 : index
    %c0_3 = arith.constant 0 : index
    %4 = vector.load %arg3[%c0_2, %c0_3] : memref<8x128xbf16, #tpu.memory_space<vmem>>, vector<8x128xbf16>
    %c0_4 = arith.constant 0 : index
    %c0_5 = arith.constant 0 : index
    %5 = vector.load %arg4[%c0_4, %c0_5] : memref<128x128xbf16, #tpu.memory_space<vmem>>, vector<128x128xbf16>
    %cst = arith.constant dense<0.000000e+00> : vector<8x128xf32>
    %6 = tpu.matmul %4, %5, %cst {dimension_numbers = #tpu.dot_dimension_numbers<[1], [0], [0], [1], [0, 0, 1, 1], [], []>} : vector<8x128xbf16>, vector<128x128xbf16>, vector<8x128xf32> -> vector<8x128xf32>
    %7 = arith.addf %3, %6 : vector<8x128xf32>
    %c0_6 = arith.constant 0 : index
    %c0_7 = arith.constant 0 : index
    %8 = vector.load %arg7[%c0_6, %c0_7] : memref<8x128xf32, #tpu.memory_space<vmem>>, vector<8x128xf32>
    tpu.vector_store %arg7[%c0_6, %c0_7], %7 {strides = array<i32>} : memref<8x128xf32, #tpu.memory_space<vmem>>, vector<8x128xf32>,
    %c0_i32_8 = arith.constant 0 : i32
    %9 = arith.cmpi eq, %arg2, %c0_i32_8 : i32
    %10 = arith.extui %9 : i1 to i32
    %c0_i32_9 = arith.constant 0 : i32
    %11 = arith.cmpi ne, %10, %c0_i32_9 : i32
    scf.if %11 {
      %c0_10 = arith.constant 0 : index
      %c0_11 = arith.constant 0 : index
      %12 = vector.load %arg7[%c0_10, %c0_11] : memref<8x128xf32, #tpu.memory_space<vmem>>, vector<8x128xf32>
      %cst_12 = arith.constant 0.000000e+00 : f32
      %13 = vector.broadcast %cst_12 : f32 to vector<8x128xf32>
      %14 = arith.maximumf %12, %13 : vector<8x128xf32>
      %c0_13 = arith.constant 0 : index
      %c0_14 = arith.constant 0 : index
      %15 = vector.load %arg6[%c0_13, %c0_14] : memref<8x128xf32, #tpu.memory_space<vmem>>, vector<8x128xf32>
      tpu.vector_store %arg6[%c0_13, %c0_14], %14 {strides = array<i32>} : memref<8x128xf32, #tpu.memory_space<vmem>>, vector<8x128xf32>,
    } else {
    }
    return
  }
  func.func @transform_0(%arg0: i32, %arg1: i32, %arg2: i32) -> (i32, i32) {
    %c0_i32 = arith.constant 0 : i32
    return %arg0, %arg2 : i32, i32
  }
  func.func @transform_1(%arg0: i32, %arg1: i32, %arg2: i32) -> (i32, i32) {
    %c0_i32 = arith.constant 0 : i32
    return %arg2, %arg1 : i32, i32
  }
  func.func @transform_2(%arg0: i32, %arg1: i32, %arg2: i32) -> (i32, i32) {
    %c0_i32 = arith.constant 0 : i32
    %c0_i32_0 = arith.constant 0 : i32
    return %c0_i32, %arg1 : i32, i32
  }
  func.func @transform_3(%arg0: i32, %arg1: i32, %arg2: i32) -> (i32, i32) {
    %c0_i32 = arith.constant 0 : i32
    return %arg0, %arg1 : i32, i32
  }
}

</mosaic_0001>

<bundles_post_ra>
// kernel: tpu_custom_call.1
= control target key start
LH: loop header
LB: loop body
LE: loop exit
PB: predicated region body
PF: predicated region fallthrough
CT: control target
= control target key end

     0   :  { %8 = vsyncpa [#allocation4], 0  ;;  %s382_s0 = inlined_call_operand.hbm [shape: bf16[8,128], index: 0, kind: input, shape index: {}]   ;;  %s383_s1 = inlined_call_operand.hbm [shape: bf16[128,128], index: 1, kind: input, shape index: {}]   ;;  %s384_s2 = inlined_call_operand.vmem [shape: f32[1,128], index: 2, kind: input, shape index: {}]   ;;  %s385_s3 = inlined_call_operand.hbm [shape: f32[8,128], index: 3, kind: output, shape index: {}]  }
   0x1   :  { %9 = vsyncpa [#allocation7], 0 }
   0x2   :  { %10 = vsyncpa [#allocation5], 0  ;;  %s309_s12 = smov [#allocation3]   ;;  %s310_s14 = smov [#allocation6]  }
   0x3   :  { %s17_s13 = sshll.u32 %s309_s12, 4  ;;  %s26_s15 = sshll.u32 %s310_s14, 4  ;;  %s18_s13 = int_to_ptr.vmem [resolvable:$true] %s17_s13  ;;  %s336_s15 = int_to_ptr.vmem [resolvable:$true] %s26_s15 }
   0x4   :  { %s237_s18 = scalar_lea.hbm %s382_s0, 64 }
   0x5   :  { %p238_p0 = scmp.ne.s32.totalorder %s382_s0, %s237_s18  ;;  %p241_p1 = scmp.lt.u32.totalorder %s237_s18, %s382_s0 }
   0x7   :  { %p243_p2 = pnand %p241_p1, %p238_p0 }
   0x9   :  { %246 = shalt.err (!%p243_p2)
}
   0xa   :  { %s247_s23 = scalar_lea.vmem %s18_s13, 64  ;;  %p252_p4 = scmp.lt.s32.totalorder %s18_s13, %s18_s13 }
   0xb   :  { %p248_p3 = scmp.ne.s32.totalorder %s18_s13, %s247_s23  ;;  %p253_p5 = scmp.lt.s32.totalorder %s247_s23, %s247_s23 }
   0xd   :  { %p254_p6 = por %p253_p5, %p252_p4 }
   0xf   :  { %p255_p7 = pnand %p254_p6, %p248_p3 }
  0x11   :  { %258 = shalt.err (!%p255_p7)
}
  0x12   :  { %20 = dma.hbm_to_vmem [thread:$0]  %s382_s0, 64, %s18_s13, [#allocation4]  }
  0x13   :  { %s259_s28 = scalar_lea.hbm %s383_s1, 1024 }
  0x14   :  { %p260_p8 = scmp.ne.s32.totalorder %s383_s1, %s259_s28  ;;  %p263_p9 = scmp.lt.u32.totalorder %s259_s28, %s383_s1 }
  0x16   :  { %p265_p10 = pnand %p263_p9, %p260_p8 }
  0x18   :  { %268 = shalt.err (!%p265_p10)
}
  0x19   :  { %s269_s6 = scalar_lea.vmem %s336_s15, 1024  ;;  %p274_p12 = scmp.lt.s32.totalorder %s336_s15, %s336_s15 }
  0x1a   :  { %p270_p11 = scmp.ne.s32.totalorder %s336_s15, %s269_s6  ;;  %p275_p13 = scmp.lt.s32.totalorder %s269_s6, %s269_s6 }
  0x1c   :  { %p276_p0 = por %p275_p13, %p274_p12 }
  0x1e   :  { %p277_p1 = pnand %p276_p0, %p270_p11 }
  0x20   :  { %280 = shalt.err (!%p277_p1)
}
  0x21   :  { %s311_s0 = smov 64   ;;  %s312_s7 = smov 4  }
  0x22   :  { %32 = dma.hbm_to_vmem [thread:$0]  %s383_s1, 1024, %s336_s15, [#allocation7], %s311_s0, %s311_s0, %s312_s7  }
  0x23   :  { %303 = dma.done.wait [#allocation4], 64  }
  0x24   :  { %304 = vsyncadd [#allocation4], 4294967232 }
  0x25   :  { %305 = dma.done.wait [#allocation7], 1024  }
  0x26   :  { %306 = vsyncadd [#allocation7], 4294966272  ;;  %v313_v0 = vmov 0.0   ;;  %vm314_vm0 = vmmov 0   ;;  %v229_v1 = vld [vmem:[#allocation6] sm:$0xff]   ;;  %v230_v2 = vld [vmem:[#allocation6 + $0x8] sm:$0xff]  }
  0x27   :  { %202 = vmatprep.subr.bf16.mxu0 %v313_v0  ;;  %218 = vmatprep.mubr.msk.bf16.mxu0 %vm314_vm0, %v313_v0  ;;  %v231_v3 = vld [vmem:[#allocation6 + $0x10] sm:$0xff]   ;;  %v232_v4 = vld [vmem:[#allocation6 + $0x18] sm:$0xff]   ;;  %v233_v5 = vld [vmem:[#allocation6 + $0x20] sm:$0xff]   ;;  %s315_s11 = smov [#allocation8]  }
  0x28   :  { %203 = vmatpush3.bf16.msra.mxu0 %v229_v1  ;;  %v234_v6 = vld [vmem:[#allocation6 + $0x28] sm:$0xff]   ;;  %v235_v7 = vld [vmem:[#allocation6 + $0x30] sm:$0xff]   ;;  %v236_v8 = vld [vmem:[#allocation6 + $0x38] sm:$0xff]   ;;  %s174_s12 = sshll.u32 %s315_s11, 4  ;;  %s175_s12 = int_to_ptr.vmem [resolvable:$true] %s174_s12 }
  0x29   :  { %204 = vmatprep.subr.bf16.mxu0 %v313_v0  ;;  %v55_v9 = vld [vmem:[#allocation3] sm:$0xf]  ;;  %s281_s13 = scalar_lea.vmem %s175_s12, 128  ;;  %p286_p3 = scmp.lt.s32.totalorder %s175_s12, %s175_s12 }
  0x2a   :  { %v184_v10 = vld [vmem:[%s384_s2] ss:$0 sm:$0xff]  ;;  %p282_p2 = scmp.ne.s32.totalorder %s175_s12, %s281_s13  ;;  %p287_p4 = scmp.lt.s32.totalorder %s281_s13, %s281_s13 }
  0x2c   :  { %205 = vmatpush3.bf16.msra.mxu0 %v230_v2  ;;  %p288_p5 = por %p287_p4, %p286_p3 }
  0x2d   :  { %206 = vmatprep.subr.bf16.mxu0 %v313_v0 }
  0x2e   :  { %p289_p6 = pnand %p288_p5, %p282_p2 }
  0x30   :  { %207 = vmatpush3.bf16.msra.mxu0 %v231_v3 }
  0x31   :  { %208 = vmatprep.subr.bf16.mxu0 %v313_v0 }
  0x34   :  { %209 = vmatpush3.bf16.msra.mxu0 %v232_v4 }
  0x35   :  { %210 = vmatprep.subr.bf16.mxu0 %v313_v0 }
  0x38   :  { %211 = vmatpush3.bf16.msra.mxu0 %v233_v5 }
  0x39   :  { %212 = vmatprep.subr.bf16.mxu0 %v313_v0 }
  0x3c   :  { %213 = vmatpush3.bf16.msra.mxu0 %v234_v6 }
  0x3d   :  { %214 = vmatprep.subr.bf16.mxu0 %v313_v0 }
  0x40   :  { %215 = vmatpush3.bf16.msra.mxu0 %v235_v7 }
  0x41   :  { %216 = vmatprep.subr.bf16.mxu0 %v313_v0 }
  0x44   :  { %217 = vmatpush3.bf16.msra.mxu0 %v236_v8 }
  0x47   :  { %219 = vmatmul.mubr.bf16.vlgmr.msra.gmra.mrb[0].mxu0 %v55_v9 }
 0x11a   :  { %v154_v11 = vpop.f32.mrb[0].mxu0 }
 0x11b   :  { %v160_v12 = vadd.f32 %v184_v10, %v154_v11  ;;  %v220_v13 = vpop.f32.mrb[1].mxu0 }
 0x11c   :  { %v157_v14 = vpop.f32.mrb[2].mxu0 }
 0x11d   :  { %v166_v15 = vmax.f32 %v160_v12, 0.0  ;;  %v221_v16 = vpop.f32.mrb[3].mxu0 }
 0x11f   :  { %167 = vst [vmem:[#allocation8] sm:$0xff] %v166_v15 }
 0x120   :  { %292 = shalt.err (!%p289_p6)
}
 0x121   :  { %s293_s2 = scalar_lea.hbm %s385_s3, 128 }
 0x122   :  { %p294_p7 = scmp.ne.s32.totalorder %s385_s3, %s293_s2  ;;  %p297_p8 = scmp.lt.u32.totalorder %s293_s2, %s385_s3 }
 0x124   :  { %p299_p9 = pnand %p297_p8, %p294_p7 }
 0x126   :  { %302 = shalt.err (!%p299_p9)
}
 0x127   :  { %177 = dma.vmem_to_hbm [thread:$0]  %s175_s12, 128, %s385_s3, [#allocation5]  }
 0x128   :  { %307 = dma.done.wait [#allocation5], 128  }
 0x129   :  { %308 = vsyncadd [#allocation5], 4294967168 }
 0x12a   :  { %181 = vsyncpa [#allocation4], 1 }
 0x12b   :  { %182 = vsyncpa [#allocation7], 1 }
 0x12c   :  { %183 = vsyncpa [#allocation5], 1 }

</bundles_post_ra>
